<compile_context>
chip_gen: v6e
topology: v6e:2x2x1
jax: 0.10.0
libtpu: 0.0.40
codegen_flags: <defaults>
</compile_context>

<pallas_src>
import functools

import jax
import jax.numpy as jnp
from jax import lax
from jax.experimental import pallas as pl
from jax.experimental.pallas import tpu as pltpu


def _nll_kernel(n_rows, n_classes, x_ref, tgt_ref, sum_ref, cnt_ref, acc_ref):
    """Per-(row-tile, class-tile) one-hot pick with per-row-tile partial outputs.

    x_ref:   (TN, TC) log-prob tile (VMEM, native dtype)
    tgt_ref: (TN, 1)  int32 target tile (VMEM)
    sum_ref: (1, 1)   f32 partial masked-sum for this row tile (SMEM output)
    cnt_ref: (1, 1)   f32 valid-target count for this row tile (SMEM output)
    acc_ref: (TN, 1)  f32 VMEM per-row accumulator (reset per row tile)
    """
    ni = pl.program_id(0)              # row-tile index ('parallel')
    ci = pl.program_id(1)              # class-tile index (reduction axis, last)
    c_last = pl.num_programs(1) - 1
    tn, tc = x_ref.shape

    @pl.when(ci == 0)
    def _():
        acc_ref[...] = jnp.zeros_like(acc_ref)

    tgt = tgt_ref[...]                                            # (TN, 1) int32
    row_ids = lax.broadcasted_iota(jnp.int32, (tn, 1), 0) + ni * tn
    # Row inside true [0, N) and target in-range -> matches ignore_index=-100
    # (any out-of-range target is treated as ignored; see NOTE at top).
    valid = (row_ids < n_rows) & (tgt >= 0) & (tgt < n_classes)   # (TN, 1) bool

    # Fold validity + global->local column offset into the (TN, 1) target so the
    # only full-tile VPU ops are a single compare and a single select.
    safe_tgt = jnp.where(valid, tgt, -1) - ci * tc                # (TN, 1)
    local_cols = lax.broadcasted_iota(jnp.int32, (tn, tc), 1)     # (TN, TC)
    mask = local_cols == safe_tgt                                 # (TN, TC)

    x = x_ref[...]                                                # native dtype (bf16 ok)
    picked = jnp.where(mask, x, jnp.zeros((), x.dtype))           # (TN, TC)
    # Lane reduce on the XLU -> (TN, 1). Exact even in bf16 since at most one
    # element per row is non-zero within a tile.
    partial = jnp.sum(picked, axis=1, keepdims=True).astype(jnp.float32)
    acc_ref[...] += partial                                       # (TN, 1) add only

    @pl.when(ci == c_last)
    def _():
        sum_ref[0, 0] = jnp.sum(acc_ref[...])                     # (TN, 1) reduce
        cnt_ref[0, 0] = jnp.sum(valid.astype(jnp.float32))


def _pick_tile(dim, want, align):
    """Largest legal tile <= want (multiple of `align`, or the full dim)."""
    if dim <= want:
        return dim                      # block == full array dim (always legal)
    return max((want // align) * align, align)


def _sublane_align(dtype):
    return {4: 8, 2: 16, 1: 32}.get(jnp.dtype(dtype).itemsize, 8)


def _vmem_budget_bytes():
    """Per-generation VMEM budget: physical capacity minus compiler headroom."""
    try:
        cap = int(pltpu.get_tpu_info().vmem_capacity_bytes)
    except Exception:
        cap = 64 << 20                  # conservative fallback (v7x-sized)
    return max(cap - (16 << 20), 16 << 20)


def _resolve_tiles(N, C, dtype, tile_n, tile_c, budget_bytes):
    itemsize = jnp.dtype(dtype).itemsize
    if tile_n is None:
        tile_n = 512
    if tile_c is None:
        tile_c = 4096 if itemsize >= 4 else 8192   # bigger class tile for bf16/fp8
    tn = _pick_tile(N, tile_n, _sublane_align(dtype))
    tc = _pick_tile(C, tile_c, 128)

    def footprint(tn_, tc_):
        return (2 * tn_ * tc_ * itemsize        # x tile, double-buffered
                + 2 * tn_ * 128 * 4             # target tile (lane-padded), 2 bufs
                + tn_ * 128 * 4                 # (tn, 1) acc scratch (lane-padded)
                + (2 << 20))                    # slack for compiler internals

    # Shrink the class tile until double-buffered inputs + scratch fit.
    while footprint(tn, tc) > budget_bytes and tc > 128:
        tc = max(((tc // 2) // 128) * 128, 128)
    return tn, tc, footprint(tn, tc)


def loss_criterion(output, targets, criterion_type="flooded_cross",
                   flood_b=0.0, tile_n=None, tile_c=None):
    """Returns (loss, raw_loss), matching LossCriterion.forward semantics."""
    N, C = output.shape
    tgt2d = targets.astype(jnp.int32).reshape(N, 1)

    budget = _vmem_budget_bytes()
    tn, tc, vmem_bytes = _resolve_tiles(N, C, output.dtype, tile_n, tile_c, budget)
    grid_n = pl.cdiv(N, tn)
    grid = (grid_n, pl.cdiv(C, tc))
    vmem_limit = int(min(max(vmem_bytes, 16 << 20), budget))

    kernel = functools.partial(_nll_kernel, int(N), int(C))

    sums, cnts = pl.pallas_call(
        kernel,
        out_shape=(jax.ShapeDtypeStruct((grid_n, 1), jnp.float32),
                   jax.ShapeDtypeStruct((grid_n, 1), jnp.float32)),
        grid_spec=pltpu.PrefetchScalarGridSpec(
            num_scalar_prefetch=0,
            grid=grid,
            in_specs=[
                pl.BlockSpec((tn, tc), lambda i, j: (i, j)),
                pl.BlockSpec((tn, 1), lambda i, j: (i, 0)),
            ],
            out_specs=[
                pl.BlockSpec((1, 1), lambda i, j: (i, 0),
                             memory_space=pltpu.MemorySpace.SMEM),
                pl.BlockSpec((1, 1), lambda i, j: (i, 0),
                             memory_space=pltpu.MemorySpace.SMEM),
            ],
            scratch_shapes=[
                pltpu.VMEM((tn, 1), jnp.float32),   # per-row partial accumulator
            ],
        ),
        compiler_params=pltpu.CompilerParams(
            dimension_semantics=("parallel", "arbitrary"),
            vmem_limit_bytes=vmem_limit),
    )(output, tgt2d)

    total = jnp.sum(sums)
    denom = jnp.maximum(jnp.sum(cnts), 1.0)
    raw_loss = -total / denom                        # NLLLoss(reduction='mean')

    if criterion_type == "cross":
        return raw_loss, raw_loss
    elif criterion_type == "flooded_cross":
        b = jnp.float32(flood_b)
        flooded = jnp.abs(raw_loss - b) + b          # arxiv 2002.08709
        return flooded, raw_loss
    else:
        raise NotImplementedError(f"criterion '{criterion_type}' not implemented")


def _ref_nll(log_probs, targets, ignore_index=-100):
    """Pure-JAX reference matching nn.NLLLoss(reduction='mean', ignore_index=-100)."""
    valid = targets != ignore_index
    safe_t = jnp.where(valid, targets, 0)
    picked = jnp.take_along_axis(log_probs, safe_t[:, None], axis=1)[:, 0]
    picked = picked.astype(jnp.float32)
    s = jnp.sum(jnp.where(valid, picked, 0.0))
    n = jnp.maximum(jnp.sum(valid), 1)
    return -s / n


if __name__ == "__main__":
    key = jax.random.PRNGKey(0)
    k1, k2, k3, k4, k5, k6 = jax.random.split(key, 6)
    flood_b = 0.25

    # Case 1: aligned small shapes (N = batch*seq = 16 samples, C = 128 classes).
    N, C = 16, 128
    logits = jax.random.normal(k1, (N, C), dtype=jnp.float32)
    log_probs = jax.nn.log_softmax(logits, axis=-1)
    targets = jax.random.randint(k2, (N,), 0, C, dtype=jnp.int32)

    loss, raw = loss_criterion(log_probs, targets,
                               criterion_type="flooded_cross", flood_b=flood_b)
    loss, raw = jax.block_until_ready((loss, raw))
    ref_raw = _ref_nll(log_probs, targets)
    ref_flood = jnp.abs(ref_raw - flood_b) + flood_b
    assert jnp.allclose(raw, ref_raw, atol=1e-5, rtol=1e-5), (raw, ref_raw)
    assert jnp.allclose(loss, ref_flood, atol=1e-5, rtol=1e-5), (loss, ref_flood)

    loss_c, raw_c = loss_criterion(log_probs, targets, criterion_type="cross")
    jax.block_until_ready((loss_c, raw_c))
    assert jnp.allclose(raw_c, ref_raw, atol=1e-5, rtol=1e-5)

    # Case 2: ragged N & C with tiled grid and ignore_index=-100 padding targets.
    N2, C2 = 50, 300
    logits2 = jax.random.normal(k3, (N2, C2), dtype=jnp.float32)
    log_probs2 = jax.nn.log_softmax(logits2, axis=-1)
    targets2 = jax.random.randint(k4, (N2,), 0, C2, dtype=jnp.int32)
    targets2 = targets2.at[3].set(-100).at[17].set(-100)   # ignored padding tokens

    loss2, raw2 = loss_criterion(log_probs2, targets2,
                                 criterion_type="flooded_cross", flood_b=flood_b,
                                 tile_n=16, tile_c=128)    # grid (4, 3), ragged tails
    loss2, raw2 = jax.block_until_ready((loss2, raw2))
    ref_raw2 = _ref_nll(log_probs2, targets2)
    ref_flood2 = jnp.abs(ref_raw2 - flood_b) + flood_b
    assert jnp.allclose(raw2, ref_raw2, atol=1e-5, rtol=1e-5), (raw2, ref_raw2)
    assert jnp.allclose(loss2, ref_flood2, atol=1e-5, rtol=1e-5), (loss2, ref_flood2)

    # Case 3: bf16 log-probs exercise the native-dtype (no full-tile f32 cast) path.
    N3, C3 = 24, 200
    logits3 = jax.random.normal(k5, (N3, C3), dtype=jnp.float32)
    log_probs3 = jax.nn.log_softmax(logits3, axis=-1).astype(jnp.bfloat16)
    targets3 = jax.random.randint(k6, (N3,), 0, C3, dtype=jnp.int32)
    targets3 = targets3.at[5].set(-100)

    loss3, raw3 = loss_criterion(log_probs3, targets3,
                                 criterion_type="flooded_cross", flood_b=flood_b)
    loss3, raw3 = jax.block_until_ready((loss3, raw3))
    ref_raw3 = _ref_nll(log_probs3, targets3)
    ref_flood3 = jnp.abs(ref_raw3 - flood_b) + flood_b
    assert jnp.allclose(raw3, ref_raw3, atol=1e-3, rtol=1e-3), (raw3, ref_raw3)
    assert jnp.allclose(loss3, ref_flood3, atol=1e-3, rtol=1e-3), (loss3, ref_flood3)

    print("KERNEL_OK")
</pallas_src>

<mosaic_0001>
module attributes {stable_mosaic.version = 11 : i64} {
  func.func @_nll_kernel(%arg0: i32, %arg1: i32, %arg2: memref<16x128xf32, #tpu.memory_space<vmem>>, %arg3: memref<16x1xi32, #tpu.memory_space<vmem>>, %arg4: memref<1x1xf32, #tpu.memory_space<smem>>, %arg5: memref<1x1xf32, #tpu.memory_space<smem>>, %arg6: memref<16x1xf32, #tpu.memory_space<vmem>>) attributes {dimension_semantics = [#tpu.dimension_semantics<parallel>, #tpu.dimension_semantics<arbitrary>], iteration_bounds = array<i64: 1, 1>, scalar_prefetch = 0 : i64, scratch_operands = 1 : i64, tpu.core_type = #tpu.core_type<tc>, window_params = [{transform_indices = @transform_0, window_bounds = array<i64: 16, 128>}, {transform_indices = @transform_1, window_bounds = array<i64: 16, 1>}, {transform_indices = @transform_2, window_bounds = array<i64: 1, 1>}, {transform_indices = @transform_3, window_bounds = array<i64: 1, 1>}]} {
    %c0_i32 = arith.constant 0 : i32
    %0 = arith.cmpi eq, %arg1, %c0_i32 : i32
    %1 = arith.extui %0 : i1 to i32
    %c0_i32_0 = arith.constant 0 : i32
    %2 = arith.cmpi ne, %1, %c0_i32_0 : i32
    scf.if %2 {
      %cst_14 = arith.constant 0.000000e+00 : f32
      %35 = vector.broadcast %cst_14 : f32 to vector<16x1xf32>
      %c0_15 = arith.constant 0 : index
      %c0_16 = arith.constant 0 : index
      %36 = vector.load %arg6[%c0_15, %c0_16] : memref<16x1xf32, #tpu.memory_space<vmem>>, vector<16x1xf32>
      tpu.vector_store %arg6[%c0_15, %c0_16], %35 {strides = array<i32>} : memref<16x1xf32, #tpu.memory_space<vmem>>, vector<16x1xf32>,
    } else {
    }
    %c0 = arith.constant 0 : index
    %c0_1 = arith.constant 0 : index
    %3 = vector.load %arg3[%c0, %c0_1] : memref<16x1xi32, #tpu.memory_space<vmem>>, vector<16x1xi32>
    %4 = tpu.iota {dimensions = array<i32: 0>} : vector<16x1xi32>
    %c16_i32 = arith.constant 16 : i32
    %5 = arith.muli %arg0, %c16_i32 : i32
    %6 = vector.broadcast %5 : i32 to vector<16x1xi32>
    %7 = arith.addi %4, %6 : vector<16x1xi32>
    %c16_i32_2 = arith.constant 16 : i32
    %8 = vector.broadcast %c16_i32_2 : i32 to vector<16x1xi32>
    %9 = arith.cmpi slt, %7, %8 : vector<16x1xi32>
    %c0_i32_3 = arith.constant 0 : i32
    %10 = vector.broadcast %c0_i32_3 : i32 to vector<16x1xi32>
    %11 = arith.cmpi sge, %3, %10 : vector<16x1xi32>
    %12 = arith.andi %9, %11 : vector<16x1xi1>
    %c128_i32 = arith.constant 128 : i32
    %13 = vector.broadcast %c128_i32 : i32 to vector<16x1xi32>
    %14 = arith.cmpi slt, %3, %13 : vector<16x1xi32>
    %15 = arith.andi %12, %14 : vector<16x1xi1>
    %c-1_i32 = arith.constant -1 : i32
    %16 = vector.broadcast %c-1_i32 : i32 to vector<16x1xi32>
    %17 = arith.select %15, %3, %16 : vector<16x1xi1>, vector<16x1xi32>
    %c128_i32_4 = arith.constant 128 : i32
    %18 = arith.muli %arg1, %c128_i32_4 : i32
    %19 = vector.broadcast %18 : i32 to vector<16x1xi32>
    %20 = arith.subi %17, %19 : vector<16x1xi32>
    %21 = tpu.iota {dimensions = array<i32: 1>} : vector<16x128xi32>
    %22 = vector.broadcast %20 : vector<16x1xi32> to vector<16x128xi32>
    %23 = arith.cmpi eq, %21, %22 : vector<16x128xi32>
    %c0_5 = arith.constant 0 : index
    %c0_6 = arith.constant 0 : index
    %24 = vector.load %arg2[%c0_5, %c0_6] : memref<16x128xf32, #tpu.memory_space<vmem>>, vector<16x128xf32>
    %cst = arith.constant 0.000000e+00 : f32
    %25 = vector.broadcast %cst : f32 to vector<16x128xf32>
    %26 = arith.select %23, %24, %25 : vector<16x128xi1>, vector<16x128xf32>
    %cst_7 = arith.constant dense<0.000000e+00> : vector<16xf32>
    %27 = vector.multi_reduction <add>, %26, %cst_7 [1] : vector<16x128xf32> to vector<16xf32>
    %28 = vector.shape_cast %27 : vector<16xf32> to vector<16x1xf32>
    %c0_8 = arith.constant 0 : index
    %c0_9 = arith.constant 0 : index
    %29 = vector.load %arg6[%c0_8, %c0_9] : memref<16x1xf32, #tpu.memory_space<vmem>>, vector<16x1xf32>
    %30 = arith.addf %29, %28 : vector<16x1xf32>
    %c0_10 = arith.constant 0 : index
    %c0_11 = arith.constant 0 : index
    %31 = vector.load %arg6[%c0_10, %c0_11] : memref<16x1xf32, #tpu.memory_space<vmem>>, vector<16x1xf32>
    tpu.vector_store %arg6[%c0_10, %c0_11], %30 {strides = array<i32>} : memref<16x1xf32, #tpu.memory_space<vmem>>, vector<16x1xf32>,
    %c0_i32_12 = arith.constant 0 : i32
    %32 = arith.cmpi eq, %arg1, %c0_i32_12 : i32
    %33 = arith.extui %32 : i1 to i32
    %c0_i32_13 = arith.constant 0 : i32
    %34 = arith.cmpi ne, %33, %c0_i32_13 : i32
    scf.if %34 {
      %c0_14 = arith.constant 0 : index
      %c0_15 = arith.constant 0 : index
      %35 = vector.load %arg6[%c0_14, %c0_15] : memref<16x1xf32, #tpu.memory_space<vmem>>, vector<16x1xf32>
      %36 = vector.shape_cast %35 : vector<16x1xf32> to vector<1x16x1xf32>
      %cst_16 = arith.constant dense<0.000000e+00> : vector<1xf32>
      %37 = vector.multi_reduction <add>, %36, %cst_16 [1, 2] : vector<1x16x1xf32> to vector<1xf32>
      %38 = vector.shape_cast %37 : vector<1xf32> to vector<1x1x1xf32>
      %39 = vector.extract %38[0, 0, 0] : f32 from vector<1x1x1xf32>
      %c0_17 = arith.constant 0 : index
      %c0_18 = arith.constant 0 : index
      %40 = memref.load %arg4[%c0_17, %c0_18] : memref<1x1xf32, #tpu.memory_space<smem>>
      memref.store %39, %arg4[%c0_17, %c0_18] : memref<1x1xf32, #tpu.memory_space<smem>>
      %41 = arith.extui %15 : vector<16x1xi1> to vector<16x1xi32>
      %42 = arith.sitofp %41 : vector<16x1xi32> to vector<16x1xf32>
      %43 = vector.shape_cast %42 : vector<16x1xf32> to vector<1x16x1xf32>
      %cst_19 = arith.constant dense<0.000000e+00> : vector<1xf32>
      %44 = vector.multi_reduction <add>, %43, %cst_19 [1, 2] : vector<1x16x1xf32> to vector<1xf32>
      %45 = vector.shape_cast %44 : vector<1xf32> to vector<1x1x1xf32>
      %46 = vector.extract %45[0, 0, 0] : f32 from vector<1x1x1xf32>
      %c0_20 = arith.constant 0 : index
      %c0_21 = arith.constant 0 : index
      %47 = memref.load %arg5[%c0_20, %c0_21] : memref<1x1xf32, #tpu.memory_space<smem>>
      memref.store %46, %arg5[%c0_20, %c0_21] : memref<1x1xf32, #tpu.memory_space<smem>>
    } else {
    }
    return
  }
  func.func @transform_0(%arg0: i32, %arg1: i32) -> (i32, i32) {
    %c0_i32 = arith.constant 0 : i32
    return %arg0, %arg1 : i32, i32
  }
  func.func @transform_1(%arg0: i32, %arg1: i32) -> (i32, i32) {
    %c0_i32 = arith.constant 0 : i32
    %c0_i32_0 = arith.constant 0 : i32
    return %arg0, %c0_i32 : i32, i32
  }
  func.func @transform_2(%arg0: i32, %arg1: i32) -> (i32, i32) {
    %c0_i32 = arith.constant 0 : i32
    %c0_i32_0 = arith.constant 0 : i32
    return %arg0, %c0_i32 : i32, i32
  }
  func.func @transform_3(%arg0: i32, %arg1: i32) -> (i32, i32) {
    %c0_i32 = arith.constant 0 : i32
    %c0_i32_0 = arith.constant 0 : i32
    return %arg0, %c0_i32 : i32, i32
  }
}

</mosaic_0001>

<bundles_post_ra>
// kernel: tpu_custom_call.1
= control target key start
LH: loop header
LB: loop body
LE: loop exit
PB: predicated region body
PF: predicated region fallthrough
CT: control target
= control target key end

     0   :  { %9 = vsyncpa [#allocation4], 0  ;;  %v165_v2 = vmov 0   ;;  %s231_s0 = inlined_call_operand.vmem [shape: f32[16,128], index: 0, kind: input, shape index: {}]   ;;  %s232_s1 = inlined_call_operand.vmem [shape: s32[16,1], index: 1, kind: input, shape index: {}]   ;;  %s233_s2 = inlined_call_operand.hbm [shape: f32[1,1], index: 2, kind: output, shape index: {0}]   ;;  %s234_s3 = inlined_call_operand.hbm [shape: f32[1,1], index: 3, kind: output, shape index: {1}]  }
   0x1   :  { %v22_v0 = vld [vmem:[%s232_s1] sm:$0xff]  ;;  %v23_v1 = vld [vmem:[%s232_s1 + $0x8] sm:$0xff]  ;;  %144 = vset.pattern.permute.xlu0 %v165_v2 }
   0x2   :  { %vm33_vm0 = vcmp.ge.s32.totalorder %v22_v0, 0  ;;  %vm37_vm1 = vcmp.lt.s32.totalorder %v22_v0, 128  ;;  %vm34_vm2 = vcmp.ge.s32.totalorder %v23_v1, 0  ;;  %vm38_vm3 = vcmp.lt.s32.totalorder %v23_v1, 128 }
   0x3   :  { %10 = vsyncpa [#allocation6], 0  ;;  %v47_v7 = vlaneseq  ;;  %v57_v9 = vld [vmem:[%s231_s0] sm:$0xff]  ;;  %v58_v12 = vld [vmem:[%s231_s0 + $0x8] sm:$0xff]  ;;  %vm19_vm7 = vcmask 7168   ;;  %v166_v14 = vmov 0.0  }
   0x4   :  { %vm195_vm4 = vmand %vm33_vm0, %vm37_vm1  ;;  %20 = vst.msk [vmem:[#allocation2] sm:$0xff] %vm19_vm7, %v166_v14  ;;  %s167_s20 = smov [#allocation3]   ;;  %s168_s23 = smov [#allocation5]  }
   0x5   :  { %v41_v4 = vsel %vm195_vm4, %v22_v0, 4294967295  ;;  %vm201_vm5 = vmand %vm34_vm2, %vm38_vm3  ;;  %v48_v8 = vand.u32 127, %v47_v7  ;;  %21 = vst.msk [vmem:[#allocation2 + $0x8] sm:$0xff] %vm19_vm7, %v166_v14  ;;  %v134_v16 = vsel %vm195_vm4, 1.0, %v166_v14 }
   0x6   :  { %50 = vperm.xlu0 %144, %v41_v4   ;;  %v42_v6 = vsel %vm201_vm5, %v23_v1, 4294967295  ;;  %v135_v17 = vsel %vm201_vm5, 1.0, %v166_v14  ;;  %v95_v18 = vsel %vm19_vm7, %v134_v16, 0.0 }
   0x7   :  { %v96_v19 = vsel %vm19_vm7, %v135_v17, 0.0 }
   0x8   :  { %v97_v20 = vadd.f32 %v96_v19, %v95_v18 }
   0xa   :  { %53 = vperm.xlu0 %144, %v42_v6  }
   0xb   :  { %v65_v21 = vld [vmem:[#allocation2] sm:$0xff] }
   0xc   :  { %v66_v24 = vld [vmem:[#allocation2 + $0x8] sm:$0xff] }
  0x81   :  { %v51_v10 = vpop.permute.xlu0 %50 }
  0x82   :  { %vm55_vm6 = vcmp.eq.s32.totalorder %v48_v8, %v51_v10 }
  0x83   :  { %v59_v11 = vsel %vm55_vm6, %v57_v9, 0.0 }
  0x84   :  { %61 = vadd.xlane.f32.xlu1 %v59_v11 }
  0x85   :  { %v54_v13 = vpop.permute.xlu0 %53 }
  0x86   :  { %vm56_vm8 = vcmp.eq.s32.totalorder %v48_v8, %v54_v13 }
  0x87   :  { %v60_v15 = vsel %vm56_vm8, %v58_v12, 0.0 }
  0x88   :  { %63 = vadd.xlane.f32.xlu1 %v60_v15 }
  0x8c   :  { %98 = vadd.xlane.f32.xlu1 %v97_v20 }
 0x10d   :  { %v62_v22 = vpop.xlane.xlu1 %61 }
 0x10e   :  { %v67_v23 = vadd.f32 %v65_v21, %v62_v22 }
 0x110   :  { %70 = vst.msk [vmem:[#allocation2] sm:$0xff] %vm19_vm7, %v67_v23 }
 0x111   :  { %v64_v25 = vpop.xlane.xlu1 %63 }
 0x112   :  { %v68_v26 = vadd.f32 %v66_v24, %v64_v25 }
 0x114   :  { %71 = vst.msk [vmem:[#allocation2 + $0x8] sm:$0xff] %vm19_vm7, %v68_v26 }
 0x115   :  { %v99_v32 = vpop.xlane.xlu1 %98 }
 0x116   :  { %v100_v33 = vrot.slane %v99_v32, 4 }
 0x117   :  { %v75_v27 = vld [vmem:[#allocation2] sm:$0xff] }
 0x118   :  { %v77_v29 = vsel %vm19_vm7, %v75_v27, 0.0  ;;  %v101_v34 = vadd.f32 %v100_v33, %v99_v32 }
 0x11a   :  { %v102_v35 = vrot.slane %v101_v34, 2 }
 0x11b   :  { %v76_v28 = vld [vmem:[#allocation2 + $0x8] sm:$0xff] }
 0x11c   :  { %v78_v30 = vsel %vm19_vm7, %v76_v28, 0.0  ;;  %v103_v39 = vadd.f32 %v102_v35, %v101_v34 }
 0x11d   :  { %v79_v31 = vadd.f32 %v78_v30, %v77_v29 }
 0x11e   :  { %v104_v42 = vrot.slane %v103_v39, 1 }
 0x11f   :  { %80 = vadd.xlane.f32.xlu0 %v79_v31 }
 0x120   :  { %v105_v45 = vadd.f32 %v104_v42, %v103_v39 }
 0x1a8   :  { %v81_v36 = vpop.xlane.xlu0 %80 }
 0x1a9   :  { %v82_v37 = vrot.slane %v81_v36, 4 }
 0x1ab   :  { %v83_v38 = vadd.f32 %v82_v37, %v81_v36 }
 0x1ad   :  { %v84_v40 = vrot.slane %v83_v38, 2 }
 0x1af   :  { %v85_v41 = vadd.f32 %v84_v40, %v83_v38 }
 0x1b1   :  { %v86_v43 = vrot.slane %v85_v41, 1 }
 0x1b3   :  { %v87_v44 = vadd.f32 %v86_v43, %v85_v41 }
 0x1b5   :  { %136 = vpush %v87_v44 }
 0x1b6   :  { %138 = vpush %v105_v45 }
 0x1e6   :  { %s137_s0 = spop %136 }
 0x1e7   :  { %s139_s19 = spop %138  ;;  %90 = sst [smem:[#allocation3]] %s137_s0 }
 0x1e8   :  { %108 = sst [smem:[#allocation5]] %s139_s19 }
 0x1e9   :  { %116 = dma.smem_to_hbm %s167_s20, 16, %s233_s2, [#allocation4]  }
 0x1ea   :  { %124 = dma.smem_to_hbm %s168_s23, 16, %s234_s3, [#allocation6]  }
 0x1eb   :  { %161 = dma.done.wait [#allocation4], 16  }
 0x1ec   :  { %162 = vsyncadd [#allocation4], 4294967280 }
 0x1ed   :  { %163 = dma.done.wait [#allocation6], 16  }
 0x1ee   :  { %164 = vsyncadd [#allocation6], 4294967280 }
 0x1ef   :  { %131 = sfence }
 0x1f0   :  { %132 = vsyncpa [#allocation4], 1 }
 0x1f1   :  { %133 = vsyncpa [#allocation6], 1 }

</bundles_post_ra>
